<compile_context>
chip_gen: v7x
topology: tpu7x:2x2x1
jax: 0.10.0
libtpu: 0.0.40
codegen_flags: <defaults>
</compile_context>

<pallas_src>
import functools

import jax
import jax.numpy as jnp
from jax.experimental import pallas as pl
from jax.experimental.pallas import tpu as pltpu


def _ce_ls_kernel(x_ref, lab_ref, out_ref, m_ref, se_ref, ws_ref, *,
                  epsilon, n_total, c_total, tile_n, tile_c,
                  mask_rows, mask_cols):
    """One (batch tile, class chunk) grid step.

    x_ref:   (tile_n, tile_c) logits chunk in VMEM (native dtype)
    lab_ref: (tile_n, 1)      int32 labels tile in VMEM
    out_ref: (1, 1)           f32 per-batch-tile partial loss in SMEM
    m/se/ws: (tile_n, 1)      f32 online logsumexp max / sum-exp / weighted sum
    """
    j = pl.program_id(1)

    @pl.when(j == 0)
    def _():
        m_ref[...] = jnp.full(m_ref.shape, -jnp.inf, jnp.float32)
        se_ref[...] = jnp.zeros(se_ref.shape, jnp.float32)
        ws_ref[...] = jnp.zeros(ws_ref.shape, jnp.float32)

    logits = x_ref[...].astype(jnp.float32)                    # (tile_n, tile_c)
    labels = lab_ref[...]                                       # (tile_n, 1) int32

    cids = (jax.lax.broadcasted_iota(jnp.int32, (tile_n, tile_c), 1)
            + j * tile_c)

    if mask_rows:
        # Padded rows of the last batch tile hold unspecified data; force them
        # to a finite value so max/exp never see garbage (result is masked at
        # the end anyway).
        rids = (jax.lax.broadcasted_iota(jnp.int32, (tile_n, 1), 0)
                + pl.program_id(0) * tile_n)
        logits = jnp.where(rids < n_total, logits, 0.0)

    # Fused label-smoothing weights; sum over valid classes is exactly 1.
    w = jnp.where(cids == labels,
                  1.0 - epsilon + epsilon / c_total,
                  epsilon / c_total)

    if mask_cols:
        # Padded class lanes of the last class chunk: no exp mass, no weight.
        col_valid = cids < c_total
        logits = jnp.where(col_valid, logits, -1e30)
        w = jnp.where(col_valid, w, 0.0)

    # Online logsumexp update.
    chunk_max = jnp.max(logits, axis=1, keepdims=True)
    new_m = jnp.maximum(m_ref[...], chunk_max)
    alpha = jnp.exp(m_ref[...] - new_m)
    se_ref[...] = (alpha * se_ref[...]
                   + jnp.sum(jnp.exp(logits - new_m), axis=1, keepdims=True))
    m_ref[...] = new_m
    # Weighted logit sum needs no shift (it is a convex combination of logits).
    ws_ref[...] = ws_ref[...] + jnp.sum(w * logits, axis=1, keepdims=True)

    @pl.when(j == pl.num_programs(1) - 1)
    def _():
        per_row = m_ref[...] + jnp.log(se_ref[...]) - ws_ref[...]  # (tile_n, 1)
        if mask_rows:
            rids = (jax.lax.broadcasted_iota(jnp.int32, (tile_n, 1), 0)
                    + pl.program_id(0) * tile_n)
            per_row = jnp.where(rids < n_total, per_row, 0.0)
        out_ref[0, 0] = jnp.sum(per_row)


def _vmem_limit_bytes():
    """Per-generation scoped-VMEM limit (v5e/v6e: 128 MiB phys, v7x: 64 MiB)."""
    try:
        cap = int(pltpu.get_tpu_info().vmem_capacity_bytes)
    except Exception:
        cap = 64 * 1024 * 1024  # conservative: assume v7x-sized VMEM
    if cap >= 128 * 1024 * 1024:      # v5e / v6e
        return 64 * 1024 * 1024
    return 44 * 1024 * 1024           # v7x: leave headroom under 64 MiB


def _pick_tiles(n, c, itemsize, vmem_limit):
    """Choose (tile_n, tile_c) from the real working set, not just the input tile.

    Per grid step the working set is roughly:
      2 double-buffered native-dtype input copies  -> 2 * itemsize bytes/elem
      ~4 f32 temporaries of the same footprint     -> 16 bytes/elem
    """
    tile_c = c if c <= 4096 else 2048          # class chunk (multiple of 128)

    budget = int(vmem_limit * 0.7)             # headroom for compiler scratch
    per_row_bytes = tile_c * (2 * itemsize + 4 * 4)
    t = budget // max(1, per_row_bytes)
    t = max(8, min(1024, (t // 8) * 8))

    if n <= 8:
        return n, tile_c                       # single full block along batch

    # Keep >= 2 batch tiles so the "parallel" axis can shard across v7x's
    # two TensorCores (harmless on single-TC v5e/v6e).
    half = ((-(-n // 2) + 7) // 8) * 8
    return min(t, half), tile_c


def cross_entropy_label_smooth(inputs, targets, epsilon=0.1):
    """inputs: (N, C) logits (f32 or bf16); targets: (N,) int class ids -> scalar."""
    n, c = inputs.shape
    itemsize = jnp.dtype(inputs.dtype).itemsize
    vmem_limit = _vmem_limit_bytes()
    tile_n, tile_c = _pick_tiles(n, c, itemsize, vmem_limit)

    num_n_tiles = pl.cdiv(n, tile_n)
    num_c_tiles = pl.cdiv(c, tile_c)
    mask_rows = (n % tile_n) != 0
    mask_cols = (tile_c < c) and ((c % tile_c) != 0)

    labels2d = targets.astype(jnp.int32).reshape(n, 1)

    cost = pl.CostEstimate(
        flops=6 * n * c,
        transcendentals=n * c,
        bytes_accessed=n * c * itemsize + n * 4 + num_n_tiles * 4,
    )

    kernel = functools.partial(
        _ce_ls_kernel,
        epsilon=float(epsilon), n_total=n, c_total=c,
        tile_n=tile_n, tile_c=tile_c,
        mask_rows=mask_rows, mask_cols=mask_cols,
    )

    partials = pl.pallas_call(
        kernel,
        out_shape=jax.ShapeDtypeStruct((num_n_tiles, 1), jnp.float32),
        grid_spec=pltpu.PrefetchScalarGridSpec(
            num_scalar_prefetch=0,
            grid=(num_n_tiles, num_c_tiles),
            in_specs=[
                pl.BlockSpec((tile_n, tile_c), lambda i, j: (i, j)),  # logits
                pl.BlockSpec((tile_n, 1), lambda i, j: (i, 0)),       # labels
            ],
            out_specs=pl.BlockSpec((1, 1), lambda i, j: (i, 0),
                                   memory_space=pltpu.MemorySpace.SMEM),
            scratch_shapes=[
                pltpu.VMEM((tile_n, 1), jnp.float32),   # running max
                pltpu.VMEM((tile_n, 1), jnp.float32),   # running sum-exp
                pltpu.VMEM((tile_n, 1), jnp.float32),   # running weighted sum
            ],
        ),
        compiler_params=pltpu.CompilerParams(
            dimension_semantics=("parallel", "arbitrary"),
            vmem_limit_bytes=vmem_limit,
        ),
        cost_estimate=cost,
    )(inputs, labels2d)

    # Tiny final reduction: mean over batch, sum over classes == sum(all) / N.
    return jnp.sum(partials) / n


def _reference(inputs, targets, epsilon=0.1):
    # Plain-JAX reference mirroring the PyTorch forward.
    n, c = inputs.shape
    log_probs = jax.nn.log_softmax(inputs.astype(jnp.float32), axis=1)
    onehot = jax.nn.one_hot(targets, c, dtype=jnp.float32)
    smooth = (1.0 - epsilon) * onehot + epsilon / c
    return jnp.sum(jnp.mean(-smooth * log_probs, axis=0))


if __name__ == "__main__":
    key = jax.random.PRNGKey(0)
    k_logits, k_labels = jax.random.split(key)

    batch, num_classes = 8, 32
    logits = jax.random.normal(k_logits, (batch, num_classes), dtype=jnp.float32)
    labels = jax.random.randint(k_labels, (batch,), 0, num_classes, dtype=jnp.int32)

    loss = cross_entropy_label_smooth(logits, labels, epsilon=0.1)
    loss = jax.block_until_ready(loss)

    ref = _reference(logits, labels, epsilon=0.1)
    assert jnp.allclose(loss, ref, rtol=1e-5, atol=1e-5), (loss, ref)

    print("KERNEL_OK")
</pallas_src>

<mosaic_0001>
module attributes {stable_mosaic.version = 11 : i64} {
  func.func @_ce_ls_kernel(%arg0: i32, %arg1: i32, %arg2: memref<8x32xf32, #tpu.memory_space<vmem>>, %arg3: memref<8x1xi32, #tpu.memory_space<vmem>>, %arg4: memref<1x1xf32, #tpu.memory_space<smem>>, %arg5: memref<8x1xf32, #tpu.memory_space<vmem>>, %arg6: memref<8x1xf32, #tpu.memory_space<vmem>>, %arg7: memref<8x1xf32, #tpu.memory_space<vmem>>) attributes {dimension_semantics = [#tpu.dimension_semantics<parallel>, #tpu.dimension_semantics<arbitrary>], iteration_bounds = array<i64: 1, 1>, scalar_prefetch = 0 : i64, scratch_operands = 3 : i64, tpu.core_type = #tpu.core_type<tc>, window_params = [{transform_indices = @transform_0, window_bounds = array<i64: 8, 32>}, {transform_indices = @transform_1, window_bounds = array<i64: 8, 1>}, {transform_indices = @transform_2, window_bounds = array<i64: 1, 1>}]} {
    %c0_i32 = arith.constant 0 : i32
    %0 = arith.cmpi eq, %arg1, %c0_i32 : i32
    %1 = arith.extui %0 : i1 to i32
    %c0_i32_0 = arith.constant 0 : i32
    %2 = arith.cmpi ne, %1, %c0_i32_0 : i32
    scf.if %2 {
      %cst_24 = arith.constant 0xFF800000 : f32
      %40 = vector.broadcast %cst_24 : f32 to vector<8x1xf32>
      %c0_25 = arith.constant 0 : index
      %c0_26 = arith.constant 0 : index
      %41 = vector.load %arg5[%c0_25, %c0_26] : memref<8x1xf32, #tpu.memory_space<vmem>>, vector<8x1xf32>
      tpu.vector_store %arg5[%c0_25, %c0_26], %40 {strides = array<i32>} : memref<8x1xf32, #tpu.memory_space<vmem>>, vector<8x1xf32>,
      %cst_27 = arith.constant 0.000000e+00 : f32
      %42 = vector.broadcast %cst_27 : f32 to vector<8x1xf32>
      %c0_28 = arith.constant 0 : index
      %c0_29 = arith.constant 0 : index
      %43 = vector.load %arg6[%c0_28, %c0_29] : memref<8x1xf32, #tpu.memory_space<vmem>>, vector<8x1xf32>
      tpu.vector_store %arg6[%c0_28, %c0_29], %42 {strides = array<i32>} : memref<8x1xf32, #tpu.memory_space<vmem>>, vector<8x1xf32>,
      %cst_30 = arith.constant 0.000000e+00 : f32
      %44 = vector.broadcast %cst_30 : f32 to vector<8x1xf32>
      %c0_31 = arith.constant 0 : index
      %c0_32 = arith.constant 0 : index
      %45 = vector.load %arg7[%c0_31, %c0_32] : memref<8x1xf32, #tpu.memory_space<vmem>>, vector<8x1xf32>
      tpu.vector_store %arg7[%c0_31, %c0_32], %44 {strides = array<i32>} : memref<8x1xf32, #tpu.memory_space<vmem>>, vector<8x1xf32>,
    } else {
    }
    %c0 = arith.constant 0 : index
    %c0_1 = arith.constant 0 : index
    %3 = vector.load %arg2[%c0, %c0_1] : memref<8x32xf32, #tpu.memory_space<vmem>>, vector<8x32xf32>
    %c0_2 = arith.constant 0 : index
    %c0_3 = arith.constant 0 : index
    %4 = vector.load %arg3[%c0_2, %c0_3] : memref<8x1xi32, #tpu.memory_space<vmem>>, vector<8x1xi32>
    %5 = tpu.iota {dimensions = array<i32: 1>} : vector<8x32xi32>
    %c32_i32 = arith.constant 32 : i32
    %6 = arith.muli %arg1, %c32_i32 : i32
    %7 = vector.broadcast %6 : i32 to vector<8x32xi32>
    %8 = arith.addi %5, %7 : vector<8x32xi32>
    %9 = vector.broadcast %4 : vector<8x1xi32> to vector<8x32xi32>
    %10 = arith.cmpi eq, %8, %9 : vector<8x32xi32>
    %cst = arith.constant 0.903124988 : f32
    %cst_4 = arith.constant 3.125000e-03 : f32
    %11 = vector.broadcast %cst : f32 to vector<8x32xf32>
    %12 = vector.broadcast %cst_4 : f32 to vector<8x32xf32>
    %13 = arith.select %10, %11, %12 : vector<8x32xi1>, vector<8x32xf32>
    %cst_5 = arith.constant dense<0xFF800000> : vector<8xf32>
    %14 = vector.multi_reduction <maximumf>, %3, %cst_5 [1] : vector<8x32xf32> to vector<8xf32>
    %15 = vector.shape_cast %14 : vector<8xf32> to vector<8x1xf32>
    %c0_6 = arith.constant 0 : index
    %c0_7 = arith.constant 0 : index
    %16 = vector.load %arg5[%c0_6, %c0_7] : memref<8x1xf32, #tpu.memory_space<vmem>>, vector<8x1xf32>
    %17 = arith.maximumf %16, %15 : vector<8x1xf32>
    %c0_8 = arith.constant 0 : index
    %c0_9 = arith.constant 0 : index
    %18 = vector.load %arg5[%c0_8, %c0_9] : memref<8x1xf32, #tpu.memory_space<vmem>>, vector<8x1xf32>
    %19 = arith.subf %18, %17 : vector<8x1xf32>
    %20 = math.exp %19 : vector<8x1xf32>
    %c0_10 = arith.constant 0 : index
    %c0_11 = arith.constant 0 : index
    %21 = vector.load %arg6[%c0_10, %c0_11] : memref<8x1xf32, #tpu.memory_space<vmem>>, vector<8x1xf32>
    %22 = arith.mulf %20, %21 : vector<8x1xf32>
    %23 = vector.broadcast %17 : vector<8x1xf32> to vector<8x32xf32>
    %24 = arith.subf %3, %23 : vector<8x32xf32>
    %25 = math.exp %24 : vector<8x32xf32>
    %cst_12 = arith.constant dense<0.000000e+00> : vector<8xf32>
    %26 = vector.multi_reduction <add>, %25, %cst_12 [1] : vector<8x32xf32> to vector<8xf32>
    %27 = vector.shape_cast %26 : vector<8xf32> to vector<8x1xf32>
    %28 = arith.addf %22, %27 : vector<8x1xf32>
    %c0_13 = arith.constant 0 : index
    %c0_14 = arith.constant 0 : index
    %29 = vector.load %arg6[%c0_13, %c0_14] : memref<8x1xf32, #tpu.memory_space<vmem>>, vector<8x1xf32>
    tpu.vector_store %arg6[%c0_13, %c0_14], %28 {strides = array<i32>} : memref<8x1xf32, #tpu.memory_space<vmem>>, vector<8x1xf32>,
    %c0_15 = arith.constant 0 : index
    %c0_16 = arith.constant 0 : index
    %30 = vector.load %arg5[%c0_15, %c0_16] : memref<8x1xf32, #tpu.memory_space<vmem>>, vector<8x1xf32>
    tpu.vector_store %arg5[%c0_15, %c0_16], %17 {strides = array<i32>} : memref<8x1xf32, #tpu.memory_space<vmem>>, vector<8x1xf32>,
    %c0_17 = arith.constant 0 : index
    %c0_18 = arith.constant 0 : index
    %31 = vector.load %arg7[%c0_17, %c0_18] : memref<8x1xf32, #tpu.memory_space<vmem>>, vector<8x1xf32>
    %32 = arith.mulf %13, %3 : vector<8x32xf32>
    %cst_19 = arith.constant dense<0.000000e+00> : vector<8xf32>
    %33 = vector.multi_reduction <add>, %32, %cst_19 [1] : vector<8x32xf32> to vector<8xf32>
    %34 = vector.shape_cast %33 : vector<8xf32> to vector<8x1xf32>
    %35 = arith.addf %31, %34 : vector<8x1xf32>
    %c0_20 = arith.constant 0 : index
    %c0_21 = arith.constant 0 : index
    %36 = vector.load %arg7[%c0_20, %c0_21] : memref<8x1xf32, #tpu.memory_space<vmem>>, vector<8x1xf32>
    tpu.vector_store %arg7[%c0_20, %c0_21], %35 {strides = array<i32>} : memref<8x1xf32, #tpu.memory_space<vmem>>, vector<8x1xf32>,
    %c0_i32_22 = arith.constant 0 : i32
    %37 = arith.cmpi eq, %arg1, %c0_i32_22 : i32
    %38 = arith.extui %37 : i1 to i32
    %c0_i32_23 = arith.constant 0 : i32
    %39 = arith.cmpi ne, %38, %c0_i32_23 : i32
    scf.if %39 {
      %c0_24 = arith.constant 0 : index
      %c0_25 = arith.constant 0 : index
      %40 = vector.load %arg5[%c0_24, %c0_25] : memref<8x1xf32, #tpu.memory_space<vmem>>, vector<8x1xf32>
      %c0_26 = arith.constant 0 : index
      %c0_27 = arith.constant 0 : index
      %41 = vector.load %arg6[%c0_26, %c0_27] : memref<8x1xf32, #tpu.memory_space<vmem>>, vector<8x1xf32>
      %42 = math.log %41 : vector<8x1xf32>
      %43 = arith.addf %40, %42 : vector<8x1xf32>
      %c0_28 = arith.constant 0 : index
      %c0_29 = arith.constant 0 : index
      %44 = vector.load %arg7[%c0_28, %c0_29] : memref<8x1xf32, #tpu.memory_space<vmem>>, vector<8x1xf32>
      %45 = arith.subf %43, %44 : vector<8x1xf32>
      %46 = vector.shape_cast %45 : vector<8x1xf32> to vector<1x8x1xf32>
      %cst_30 = arith.constant dense<0.000000e+00> : vector<1xf32>
      %47 = vector.multi_reduction <add>, %46, %cst_30 [1, 2] : vector<1x8x1xf32> to vector<1xf32>
      %48 = vector.shape_cast %47 : vector<1xf32> to vector<1x1x1xf32>
      %49 = vector.extract %48[0, 0, 0] : f32 from vector<1x1x1xf32>
      %c0_31 = arith.constant 0 : index
      %c0_32 = arith.constant 0 : index
      %50 = memref.load %arg4[%c0_31, %c0_32] : memref<1x1xf32, #tpu.memory_space<smem>>
      memref.store %49, %arg4[%c0_31, %c0_32] : memref<1x1xf32, #tpu.memory_space<smem>>
    } else {
    }
    return
  }
  func.func @transform_0(%arg0: i32, %arg1: i32) -> (i32, i32) {
    %c0_i32 = arith.constant 0 : i32
    return %arg0, %arg1 : i32, i32
  }
  func.func @transform_1(%arg0: i32, %arg1: i32) -> (i32, i32) {
    %c0_i32 = arith.constant 0 : i32
    %c0_i32_0 = arith.constant 0 : i32
    return %arg0, %c0_i32 : i32, i32
  }
  func.func @transform_2(%arg0: i32, %arg1: i32) -> (i32, i32) {
    %c0_i32 = arith.constant 0 : i32
    %c0_i32_0 = arith.constant 0 : i32
    return %arg0, %c0_i32 : i32, i32
  }
}

</mosaic_0001>

<bundles_post_ra>
// kernel: tpu_custom_call.1
= control target key start
LH: loop header
LB: loop body
LE: loop exit
PB: predicated region body
PF: predicated region fallthrough
CT: control target
= control target key end

     0   :  { %vm32_vm0 = vcmask 261120   ;;  %s175_s0 = inlined_call_operand.vmem [shape: f32[8,32], index: 0, kind: input, shape index: {}]   ;;  %s176_s1 = inlined_call_operand.vmem [shape: s32[8,1], index: 1, kind: input, shape index: {}]   ;;  %s177_s2 = inlined_call_operand.hbm [shape: f32[1,1], index: 2, kind: output, shape index: {}]  }
   0x1   :  { %v20_v0 = vld [vmem:[%s175_s0] sm:$0xff] }
   0x2   :  { %7 = vsyncpa [#allocation6], 0  ;;  %v33_v1 = vsel %vm32_vm0, %v20_v0, -inf  ;;  %vm16_vm1 = vcmask 7168   ;;  %v127_v2 = vmov -inf   ;;  %v128_v3 = vmov 0  }
   0x3   :  { %34 = vmax.xlane.f32.xlu0 %v33_v1  ;;  %17 = vst.msk [vmem:[#allocation2] sm:$0xff] %vm16_vm1, %v127_v2  ;;  %108 = vset.pattern.permute.xlu1 %v128_v3  ;;  %v21_v4 = vld [vmem:[%s176_s1] sm:$0xff]  ;;  %v129_v5 = vmov 0.0   ;;  %v22_v11 = vlaneseq  ;;  %v130_v16 = vmov 0.003125   ;;  %s115_s14 = scalar_lea.hbm %s177_s2, 16 }
   0x4   :  { %107 = vset.pattern.permute.xlu0 %v128_v3  ;;  %28 = vperm.xlu1 %108, %v21_v4   ;;  %18 = vst.msk [vmem:[#allocation3] sm:$0xff] %vm16_vm1, %v129_v5  ;;  %19 = vst.msk [vmem:[#allocation4] sm:$0xff] %vm16_vm1, %v129_v5  ;;  %p116_p0 = scmp.ne.s32.totalorder %s177_s2, %s115_s14  ;;  %p119_p1 = scmp.lt.u32.totalorder %s115_s14, %s177_s2 }
   0x5   :  { %v23_v14 = vand.u32 127, %v22_v11 }
   0x6   :  { %p121_p2 = pnand %p119_p1, %p116_p0 }
   0xa   :  { %v36_v6 = vld [vmem:[#allocation2] sm:$0xff] }
   0xb   :  { %v41_v24 = vld [vmem:[#allocation3] sm:$0xff]  ;;  %v58_v28 = vld [vmem:[#allocation4] sm:$0xff] }
  0x83   :  { %v29_v15 = vpop.permute.xlu1 %28 }
  0x84   :  { %vm30_vm2 = vcmp.eq.s32.totalorder %v23_v14, %v29_v15 }
  0x85   :  { %v31_v17 = vsel %vm30_vm2, 0.903125, %v130_v16 }
  0x86   :  { %v59_v18 = vmul.f32 %v31_v17, %v20_v0 }
  0x88   :  { %v60_v21 = vsel %vm32_vm0, %v59_v18, 0.0 }
  0x90   :  { %v35_v7 = vpop.xlane.xlu0 %34 }
  0x91   :  { %v37_v8 = vmax.f32 %v36_v6, %v35_v7 }
  0x93   :  { %v38_v9 = vsub.f32 %v36_v6, %v37_v8  ;;  %57 = vst.msk [vmem:[#allocation2] sm:$0xff] %vm16_vm1, %v37_v8  ;;  %45 = vperm.xlu0 %107, %v37_v8  }
  0x95   :  { %v39_v22 = vmul.f32 1.442695, %v38_v9 }
  0x9a   :  { %v68_v34 = vld [vmem:[#allocation2] sm:$0xff] }
 0x112   :  { %v46_v10 = vpop.permute.xlu0 %45 }
 0x113   :  { %v48_v12 = vsub.f32 %v20_v0, %v46_v10 }
 0x115   :  { %v49_v13 = vmul.f32 1.442695, %v48_v12 }
 0x117   :  { %109 = vpow2.f32 %v49_v13 }
 0x118   :  { %111 = vpow2.f32 %v39_v22 }
 0x121   :  { %v110_v19 = vpop.eup %109 }
 0x122   :  { %v51_v20 = vsel %vm32_vm0, %v110_v19, 0.0  ;;  %v112_v23 = vpop.eup %111 }
 0x123   :  { %52 = vadd.xlane.f32.xlu1 %v51_v20  ;;  %v42_v25 = vmul.f32 %v112_v23, %v41_v24 }
 0x127   :  { %61 = vadd.xlane.f32.xlu1 %v60_v21 }
 0x1b0   :  { %v53_v26 = vpop.xlane.xlu1 %52 }
 0x1b1   :  { %v54_v27 = vadd.f32 %v53_v26, %v42_v25 }
 0x1b3   :  { %56 = vst.msk [vmem:[#allocation3] sm:$0xff] %vm16_vm1, %v54_v27 }
 0x1b4   :  { %v62_v29 = vpop.xlane.xlu1 %61 }
 0x1b5   :  { %v63_v30 = vadd.f32 %v62_v29, %v58_v28 }
 0x1b7   :  { %64 = vst.msk [vmem:[#allocation4] sm:$0xff] %vm16_vm1, %v63_v30 }
 0x1ba   :  { %v69_v31 = vld [vmem:[#allocation3] sm:$0xff] }
 0x1bb   :  { %113 = vlog2.f32 %v69_v31 }
 0x1be   :  { %v73_v35 = vld [vmem:[#allocation4] sm:$0xff] }
 0x1c5   :  { %v114_v32 = vpop.eup %113 }
 0x1c6   :  { %v71_v33 = vmul.f32 0.6931472, %v114_v32 }
 0x1c8   :  { %v72_v36 = vadd.f32 %v71_v33, %v68_v34 }
 0x1ca   :  { %v74_v37 = vsub.f32 %v72_v36, %v73_v35 }
 0x1cc   :  { %v75_v38 = vsel %vm16_vm1, %v74_v37, 0.0 }
 0x1cd   :  { %76 = vadd.xlane.f32.xlu1 %v75_v38 }
 0x25a   :  { %v77_v39 = vpop.xlane.xlu1 %76 }
 0x25b   :  { %v78_v40 = vrot.slane %v77_v39, 4 }
 0x25d   :  { %v79_v41 = vadd.f32 %v78_v40, %v77_v39 }
 0x25f   :  { %v80_v42 = vrot.slane %v79_v41, 2 }
 0x261   :  { %v81_v43 = vadd.f32 %v80_v42, %v79_v41 }
 0x263   :  { %v82_v44 = vrot.slane %v81_v43, 1 }
 0x265   :  { %v83_v45 = vadd.f32 %v82_v44, %v81_v43 }
 0x267   :  { %100 = vpush %v83_v45 }
 0x298   :  { %s101_s0 = spop %100 }
 0x299   :  { %86 = sst [smem:[#allocation5]] %s101_s0 }
 0x29a   :  { %124 = shalt.err (!%p121_p2)
}
 0x29b   :  { %s131_s19 = smov [#allocation5]  }
 0x29c   :  { %94 = dma.smem_to_hbm %s131_s19, 16, %s177_s2, [#allocation6]  }
 0x29d   :  { %125 = dma.done.wait [#allocation6], 16  }
 0x29e   :  { %126 = vsyncadd [#allocation6], 4294967280 }
 0x29f   :  { %98 = sfence }
 0x2a0   :  { %99 = vsyncpa [#allocation6], 1 }

</bundles_post_ra>
